<compile_context>
chip_gen: v6e
topology: v6e:2x2x1
jax: 0.10.0
libtpu: 0.0.40
codegen_flags: <defaults>
</compile_context>

<pallas_src>
import jax
import jax.numpy as jnp
from jax.experimental import pallas as pl
from jax.experimental.pallas import tpu as pltpu

HIDDEN = 64
TM = 512  # batch rows processed per grid step (512-1024 sweet spot per review)


def critic_kernel(x_ref, w1_ref, b1_ref, w2_ref, b2_ref, w3_ref, b3_ref, o_ref):
    """One batch tile of the critic MLP, computed feature-major.

    x_ref  : (TM, IN)  bf16  batch tile (rows = batch samples)
    w1_ref : (H, IN)   bf16  fc1 weight (PyTorch layout)
    b1_ref : (H, 1)    f32   fc1 bias (column)
    w2_ref : (H, H)    bf16  fc2 weight
    b2_ref : (H, 1)    f32   fc2 bias (column)
    w3_ref : (H, 1)    f32   value-head weight (column)
    b3_ref : (1, 1)    f32   value-head bias (SMEM scalar)
    o_ref  : (1, TM)   f32   lane-dense output: one value per batch row
    """
    # Put the batch on the lane axis: xt is (IN, TM). f32 transpose (XLU).
    xt = x_ref[...].astype(jnp.float32).T

    # fc1 + ReLU -> (H, TM), f32 accumulation; bias/ReLU in f32.
    h1 = jnp.dot(w1_ref[...].astype(jnp.float32), xt,
                 preferred_element_type=jnp.float32)
    h1 = jnp.maximum(h1 + b1_ref[...], 0.0)

    # fc2 + ReLU -> (H, TM); bf16 MXU inputs, f32 accumulation.
    h2 = jnp.dot(w2_ref[...], h1.astype(jnp.bfloat16),
                 preferred_element_type=jnp.float32)
    h2 = jnp.maximum(h2 + b2_ref[...], 0.0)

    # Value head: VPU multiply + sublane reduction (avoids an N=1 MXU matmul).
    v = jnp.sum(h2 * w3_ref[...], axis=0, keepdims=True) + b3_ref[0, 0]
    o_ref[...] = v.astype(o_ref.dtype)


def critic_forward(x, params, *, tile_m=TM):
    """x: [B, input_dim] float32. params in PyTorch nn.Linear layout."""
    B, in_dim = x.shape
    H = HIDDEN

    n_tiles = pl.cdiv(B, tile_m)
    b_pad = n_tiles * tile_m
    xp = x if b_pad == B else jnp.pad(x, ((0, b_pad - B), (0, 0)))

    # bf16 for the streamed/matmul operands; biases + head weight stay f32.
    xp = xp.astype(jnp.bfloat16)
    w1b = params["w1"].astype(jnp.bfloat16)                  # (H, IN)
    w2b = params["w2"].astype(jnp.bfloat16)                  # (H, H)
    b1c = params["b1"].reshape(H, 1).astype(jnp.float32)     # (H, 1)
    b2c = params["b2"].reshape(H, 1).astype(jnp.float32)     # (H, 1)
    w3c = params["w3"].reshape(1, H).T.astype(jnp.float32)   # (H, 1)
    b3c = params["b3"].reshape(1, 1).astype(jnp.float32)     # (1, 1) -> SMEM

    flops = 2 * B * (in_dim * H + H * H + H)
    bytes_accessed = (b_pad * in_dim * 2            # x (bf16)
                      + B * 4                       # output (f32)
                      + (H * in_dim + H * H) * 2    # bf16 weights
                      + (H + H + H + 1) * 4)        # f32 biases + head weight

    out = pl.pallas_call(
        critic_kernel,
        out_shape=jax.ShapeDtypeStruct((1, b_pad), jnp.float32),
        grid=(n_tiles,),
        in_specs=[
            pl.BlockSpec((tile_m, in_dim), lambda i: (i, 0)),   # x tile
            pl.BlockSpec((H, in_dim), lambda i: (0, 0)),        # w1 resident
            pl.BlockSpec((H, 1), lambda i: (0, 0)),             # b1
            pl.BlockSpec((H, H), lambda i: (0, 0)),             # w2
            pl.BlockSpec((H, 1), lambda i: (0, 0)),             # b2
            pl.BlockSpec((H, 1), lambda i: (0, 0)),             # w3 column
            pl.BlockSpec(memory_space=pltpu.MemorySpace.SMEM),  # b3 scalar
        ],
        out_specs=pl.BlockSpec((1, tile_m), lambda i: (0, i)),
        compiler_params=pltpu.CompilerParams(
            dimension_semantics=("parallel",)),
        cost_estimate=pl.CostEstimate(
            flops=flops, transcendentals=0, bytes_accessed=bytes_accessed),
    )(xp, w1b, b1c, w2b, b2c, w3c, b3c)

    return out[0, :B].reshape(B, 1)


def init_params(key, input_dim, hidden=HIDDEN):
    """Deterministic init mirroring nn.Linear (weights stored as [out, in])."""
    ks = jax.random.split(key, 6)

    def linear(kw, kb, fan_in, fan_out):
        bound = 1.0 / jnp.sqrt(fan_in)
        w = jax.random.uniform(kw, (fan_out, fan_in), jnp.float32, -bound, bound)
        b = jax.random.uniform(kb, (fan_out,), jnp.float32, -bound, bound)
        return w, b

    w1, b1 = linear(ks[0], ks[1], input_dim, hidden)
    w2, b2 = linear(ks[2], ks[3], hidden, hidden)
    w3, b3 = linear(ks[4], ks[5], hidden, 1)
    return {"w1": w1, "b1": b1, "w2": w2, "b2": b2, "w3": w3, "b3": b3}


def ref_forward_f32(x, p):
    """Pure-f32 reference with the exact PyTorch module semantics."""
    h1 = jnp.maximum(x @ p["w1"].T + p["b1"], 0.0)
    h2 = jnp.maximum(h1 @ p["w2"].T + p["b2"], 0.0)
    return h2 @ p["w3"].T + p["b3"]


def ref_forward_bf16(x, p):
    """Reference matching the kernel's bf16 input/weight rounding."""
    f32 = jnp.float32
    xb = x.astype(jnp.bfloat16).astype(f32)
    w1b = p["w1"].astype(jnp.bfloat16).astype(f32)
    w2b = p["w2"].astype(jnp.bfloat16).astype(f32)
    h1 = jnp.maximum(xb @ w1b.T + p["b1"], 0.0)
    h2 = jnp.maximum(h1.astype(jnp.bfloat16).astype(f32) @ w2b.T + p["b2"], 0.0)
    return h2 @ p["w3"].T + p["b3"]


if __name__ == "__main__":
    key = jax.random.PRNGKey(0)
    k_x, k_p, k_x2 = jax.random.split(key, 3)

    batch, input_dim = 8, 32
    x = jax.random.normal(k_x, (batch, input_dim), dtype=jnp.float32)
    params = init_params(k_p, input_dim)

    out = critic_forward(x, params)
    jax.block_until_ready(out)
    assert out.shape == (batch, 1)
    assert jnp.allclose(out, ref_forward_bf16(x, params), atol=1e-2, rtol=1e-2)
    assert jnp.allclose(out, ref_forward_f32(x, params), atol=5e-2, rtol=5e-2)

    # Multi-tile path: grid > 1 and a batch that is not a multiple of the tile.
    batch2 = 1100
    x2 = jax.random.normal(k_x2, (batch2, input_dim), dtype=jnp.float32)
    out2 = critic_forward(x2, params)
    jax.block_until_ready(out2)
    assert out2.shape == (batch2, 1)
    assert jnp.allclose(out2, ref_forward_bf16(x2, params), atol=1e-2, rtol=1e-2)

    print("KERNEL_OK")
</pallas_src>

<mosaic_0001>
module attributes {stable_mosaic.version = 11 : i64} {
  func.func @critic_kernel(%arg0: i32, %arg1: memref<512x32xbf16, #tpu.memory_space<vmem>>, %arg2: memref<64x32xbf16, #tpu.memory_space<vmem>>, %arg3: memref<64x1xf32, #tpu.memory_space<vmem>>, %arg4: memref<64x64xbf16, #tpu.memory_space<vmem>>, %arg5: memref<64x1xf32, #tpu.memory_space<vmem>>, %arg6: memref<64x1xf32, #tpu.memory_space<vmem>>, %arg7: memref<1x1xf32, #tpu.memory_space<smem>>, %arg8: memref<1x512xf32, #tpu.memory_space<vmem>>) attributes {dimension_semantics = [#tpu.dimension_semantics<parallel>], iteration_bounds = array<i64: 1>, scalar_prefetch = 0 : i64, scratch_operands = 0 : i64, tpu.core_type = #tpu.core_type<tc>, window_params = [{transform_indices = @transform_0, window_bounds = array<i64: 512, 32>}, {pipeline_mode = #tpu.pipeline_mode<synchronous>, transform_indices = @transform_1, window_bounds = array<i64: 64, 32>}, {pipeline_mode = #tpu.pipeline_mode<synchronous>, transform_indices = @transform_2, window_bounds = array<i64: 64, 1>}, {pipeline_mode = #tpu.pipeline_mode<synchronous>, transform_indices = @transform_3, window_bounds = array<i64: 64, 64>}, {pipeline_mode = #tpu.pipeline_mode<synchronous>, transform_indices = @transform_4, window_bounds = array<i64: 64, 1>}, {pipeline_mode = #tpu.pipeline_mode<synchronous>, transform_indices = @transform_5, window_bounds = array<i64: 64, 1>}, {transform_indices = @transform_6, window_bounds = array<i64: 1, 1>}, {transform_indices = @transform_7, window_bounds = array<i64: 1, 512>}]} {
    %c0 = arith.constant 0 : index
    %c0_0 = arith.constant 0 : index
    %0 = vector.load %arg1[%c0, %c0_0] : memref<512x32xbf16, #tpu.memory_space<vmem>>, vector<512x32xbf16>
    %1 = arith.extf %0 : vector<512x32xbf16> to vector<512x32xf32>
    %2 = tpu.transpose %1, [1, 0] : vector<512x32xf32> -> vector<32x512xf32>
    %c0_1 = arith.constant 0 : index
    %c0_2 = arith.constant 0 : index
    %3 = vector.load %arg2[%c0_1, %c0_2] : memref<64x32xbf16, #tpu.memory_space<vmem>>, vector<64x32xbf16>
    %4 = arith.extf %3 : vector<64x32xbf16> to vector<64x32xf32>
    %cst = arith.constant dense<0.000000e+00> : vector<64x512xf32>
    %5 = tpu.matmul %4, %2, %cst {dimension_numbers = #tpu.dot_dimension_numbers<[1], [0], [0], [1], [0, 0, 1, 1], [], []>} : vector<64x32xf32>, vector<32x512xf32>, vector<64x512xf32> -> vector<64x512xf32>
    %c0_3 = arith.constant 0 : index
    %c0_4 = arith.constant 0 : index
    %6 = vector.load %arg3[%c0_3, %c0_4] : memref<64x1xf32, #tpu.memory_space<vmem>>, vector<64x1xf32>
    %7 = vector.broadcast %6 : vector<64x1xf32> to vector<64x512xf32>
    %8 = arith.addf %5, %7 : vector<64x512xf32>
    %cst_5 = arith.constant 0.000000e+00 : f32
    %9 = vector.broadcast %cst_5 : f32 to vector<64x512xf32>
    %10 = arith.maximumf %8, %9 : vector<64x512xf32>
    %c0_6 = arith.constant 0 : index
    %c0_7 = arith.constant 0 : index
    %11 = vector.load %arg4[%c0_6, %c0_7] : memref<64x64xbf16, #tpu.memory_space<vmem>>, vector<64x64xbf16>
    %12 = arith.truncf %10 : vector<64x512xf32> to vector<64x512xbf16>
    %cst_8 = arith.constant dense<0.000000e+00> : vector<64x512xf32>
    %13 = tpu.matmul %11, %12, %cst_8 {dimension_numbers = #tpu.dot_dimension_numbers<[1], [0], [0], [1], [0, 0, 1, 1], [], []>} : vector<64x64xbf16>, vector<64x512xbf16>, vector<64x512xf32> -> vector<64x512xf32>
    %c0_9 = arith.constant 0 : index
    %c0_10 = arith.constant 0 : index
    %14 = vector.load %arg5[%c0_9, %c0_10] : memref<64x1xf32, #tpu.memory_space<vmem>>, vector<64x1xf32>
    %15 = vector.broadcast %14 : vector<64x1xf32> to vector<64x512xf32>
    %16 = arith.addf %13, %15 : vector<64x512xf32>
    %cst_11 = arith.constant 0.000000e+00 : f32
    %17 = vector.broadcast %cst_11 : f32 to vector<64x512xf32>
    %18 = arith.maximumf %16, %17 : vector<64x512xf32>
    %c0_12 = arith.constant 0 : index
    %c0_13 = arith.constant 0 : index
    %19 = vector.load %arg6[%c0_12, %c0_13] : memref<64x1xf32, #tpu.memory_space<vmem>>, vector<64x1xf32>
    %20 = vector.broadcast %19 : vector<64x1xf32> to vector<64x512xf32>
    %21 = arith.mulf %18, %20 : vector<64x512xf32>
    %cst_14 = arith.constant dense<0.000000e+00> : vector<512xf32>
    %22 = vector.multi_reduction <add>, %21, %cst_14 [0] : vector<64x512xf32> to vector<512xf32>
    %23 = vector.shape_cast %22 : vector<512xf32> to vector<1x512xf32>
    %c0_15 = arith.constant 0 : index
    %c0_16 = arith.constant 0 : index
    %24 = memref.load %arg7[%c0_15, %c0_16] : memref<1x1xf32, #tpu.memory_space<smem>>
    %25 = vector.broadcast %24 : f32 to vector<1x512xf32>
    %26 = arith.addf %23, %25 : vector<1x512xf32>
    %c0_17 = arith.constant 0 : index
    %c0_18 = arith.constant 0 : index
    %27 = vector.load %arg8[%c0_17, %c0_18] : memref<1x512xf32, #tpu.memory_space<vmem>>, vector<1x512xf32>
    tpu.vector_store %arg8[%c0_17, %c0_18], %26 {strides = array<i32>} : memref<1x512xf32, #tpu.memory_space<vmem>>, vector<1x512xf32>,
    return
  }
  func.func @transform_0(%arg0: i32) -> (i32, i32) {
    %c0_i32 = arith.constant 0 : i32
    %c0_i32_0 = arith.constant 0 : i32
    return %arg0, %c0_i32 : i32, i32
  }
  func.func @transform_1(%arg0: i32) -> (i32, i32) {
    %c0_i32 = arith.constant 0 : i32
    %c0_i32_0 = arith.constant 0 : i32
    %c0_i32_1 = arith.constant 0 : i32
    return %c0_i32, %c0_i32_0 : i32, i32
  }
  func.func @transform_2(%arg0: i32) -> (i32, i32) {
    %c0_i32 = arith.constant 0 : i32
    %c0_i32_0 = arith.constant 0 : i32
    %c0_i32_1 = arith.constant 0 : i32
    return %c0_i32, %c0_i32_0 : i32, i32
  }
  func.func @transform_3(%arg0: i32) -> (i32, i32) {
    %c0_i32 = arith.constant 0 : i32
    %c0_i32_0 = arith.constant 0 : i32
    %c0_i32_1 = arith.constant 0 : i32
    return %c0_i32, %c0_i32_0 : i32, i32
  }
  func.func @transform_4(%arg0: i32) -> (i32, i32) {
    %c0_i32 = arith.constant 0 : i32
    %c0_i32_0 = arith.constant 0 : i32
    %c0_i32_1 = arith.constant 0 : i32
    return %c0_i32, %c0_i32_0 : i32, i32
  }
  func.func @transform_5(%arg0: i32) -> (i32, i32) {
    %c0_i32 = arith.constant 0 : i32
    %c0_i32_0 = arith.constant 0 : i32
    %c0_i32_1 = arith.constant 0 : i32
    return %c0_i32, %c0_i32_0 : i32, i32
  }
  func.func @transform_6(%arg0: i32) -> (i32, i32) {
    %c0_i32 = arith.constant 0 : i32
    %c0_i32_0 = arith.constant 0 : i32
    %c0_i32_1 = arith.constant 0 : i32
    return %c0_i32, %c0_i32_0 : i32, i32
  }
  func.func @transform_7(%arg0: i32) -> (i32, i32) {
    %c0_i32 = arith.constant 0 : i32
    %c0_i32_0 = arith.constant 0 : i32
    return %c0_i32, %arg0 : i32, i32
  }
}

</mosaic_0001>

<bundles_post_ra>
// kernel: tpu_custom_call.1
= control target key start
LH: loop header
LB: loop body
LE: loop exit
PB: predicated region body
PF: predicated region fallthrough
CT: control target
= control target key end

     0   :  { %vm221_vm0 = vcmask 261120   ;;  %v1562_v8 = vmov 0   ;;  %s2023_s0 = inlined_call_operand.vmem [shape: bf16[512,32], index: 0, kind: input, shape index: {}]   ;;  %s2024_s1 = inlined_call_operand.vmem [shape: bf16[64,32], index: 1, kind: input, shape index: {}]   ;;  %s2025_s2 = inlined_call_operand.vmem [shape: f32[64,1], index: 2, kind: input, shape index: {}]   ;;  %s2026_s3 = inlined_call_operand.vmem [shape: bf16[64,64], index: 3, kind: input, shape index: {}]   ;;  %s2027_s4 = inlined_call_operand.vmem [shape: f32[64,1], index: 4, kind: input, shape index: {}]   ;;  %s2028_s5 = inlined_call_operand.vmem [shape: f32[64,1], index: 5, kind: input, shape index: {}]   ;;  %s2029_s6 = inlined_call_operand.<no memory space> [shape: f32[1,1], index: 6, kind: input, shape index: {}]   ;;  %s2030_s7 = inlined_call_operand.hbm [shape: f32[1,512], index: 7, kind: output, shape index: {}]  }
   0x1   :  { %v1415_v0 = vld [vmem:[%s2023_s0 + $0x78] sm:$0xff]   ;;  %1534 = vset.pattern.permute.xlu0 %v1562_v8  ;;  %1535 = vset.pattern.permute.xlu1 %v1562_v8  ;;  %v1414_v11 = vld [vmem:[%s2023_s0 + $0x70] sm:$0xff]   ;;  %v1413_v23 = vld [vmem:[%s2023_s0 + $0x68] sm:$0xff]  }
   0x2   :  { %v1431_v1 = vld [vmem:[%s2023_s0 + $0xf8] sm:$0xff]   ;;  %v1319_v3 = vunpack.c.l.bf16 %v1415_v0  ;;  %v1320_v4 = vunpack.c.h.bf16 %v1415_v0  ;;  %v1430_v12 = vld [vmem:[%s2023_s0 + $0xf0] sm:$0xff]   ;;  %v1316_v15 = vunpack.c.h.bf16 %v1414_v11  ;;  %v1315_v21 = vunpack.c.l.bf16 %v1414_v11  ;;  %v1429_v24 = vld [vmem:[%s2023_s0 + $0xe8] sm:$0xff]  }
   0x3   :  { %v1407_v2 = vld [vmem:[%s2023_s0 + $0x38] sm:$0xff]   ;;  %v1383_v5 = vunpack.c.l.bf16 %v1431_v1  ;;  %v1384_v6 = vunpack.c.h.bf16 %v1431_v1  ;;  %v1380_v16 = vunpack.c.h.bf16 %v1430_v12  ;;  %v1406_v17 = vld [vmem:[%s2023_s0 + $0x30] sm:$0xff]   ;;  %v1379_v22 = vunpack.c.l.bf16 %v1430_v12  ;;  %v177_v28 = vld [vmem:[%s2025_s2 + $0x20] sm:$0xff] }
   0x4   :  { %v1423_v7 = vld [vmem:[%s2023_s0 + $0xb8] sm:$0xff]   ;;  %v1288_v9 = vunpack.c.h.bf16 %v1407_v2  ;;  %1435 = vmatprep.subr.msk.mxu0 %vm221_vm0, %v1320_v4  ;;  %v1287_v13 = vunpack.c.l.bf16 %v1407_v2  ;;  %v1422_v18 = vld [vmem:[%s2023_s0 + $0xb0] sm:$0xff]   ;;  %v1284_v19 = vunpack.c.h.bf16 %v1406_v17  ;;  %v1283_v25 = vunpack.c.l.bf16 %v1406_v17  ;;  %v1405_v31 = vld [vmem:[%s2023_s0 + $0x28] sm:$0xff]   ;;  %203 = vperm.xlu1 %1535, %v177_v28  }
   0x5   :  { %v1352_v10 = vunpack.c.h.bf16 %v1423_v7  ;;  %1483 = vmatprep.subr.msk.mxu1 %vm221_vm0, %v1384_v6  ;;  %v1351_v14 = vunpack.c.l.bf16 %v1423_v7  ;;  %v1348_v20 = vunpack.c.h.bf16 %v1422_v18  ;;  %v1347_v26 = vunpack.c.l.bf16 %v1422_v18  ;;  %v179_v27 = vld [vmem:[%s2025_s2 + $0x30] sm:$0xff]  ;;  %v1421_v32 = vld [vmem:[%s2023_s0 + $0xa8] sm:$0xff]   ;;  %v1666_v33 = vld [vmem:[%s2024_s1] sm:$0xff]  }
   0x6   :  { %1436 = vmatpush3.xpose.msk.msra.mxu0 %vm221_vm0, %v1288_v9  ;;  %v1312_v29 = vunpack.c.h.bf16 %v1413_v23  ;;  %v1376_v30 = vunpack.c.h.bf16 %v1429_v24  ;;  %213 = vperm.xlu0 %1534, %v179_v27   ;;  %v180_v34 = vld [vmem:[%s2025_s2 + $0x38] sm:$0xff]  ;;  %v178_v35 = vld [vmem:[%s2025_s2 + $0x28] sm:$0xff]  ;;  %v1280_v36 = vunpack.c.h.bf16 %v1405_v31  ;;  %v1344_v37 = vunpack.c.h.bf16 %v1421_v32  ;;  %v1412_v41 = vld [vmem:[%s2023_s0 + $0x60] sm:$0xff]  }
   0x7   :  { %1484 = vmatpush3.xpose.msk.msra.mxu1 %vm221_vm0, %v1352_v10  ;;  %1437 = vmatprep.subr.msk.mxu0 %vm221_vm0, %v1319_v3  ;;  %v1311_v38 = vunpack.c.l.bf16 %v1413_v23  ;;  %v1375_v39 = vunpack.c.l.bf16 %v1429_v24  ;;  %v1679_v40 = vunpack.c.l.bf16 %v1666_v33  ;;  %v1428_v42 = vld [vmem:[%s2023_s0 + $0xe0] sm:$0xff]   ;;  %v175_v45 = vld [vmem:[%s2025_s2 + $0x10] sm:$0xff]  ;;  %v176_v46 = vld [vmem:[%s2025_s2 + $0x18] sm:$0xff]  ;;  %v1279_v47 = vunpack.c.l.bf16 %v1405_v31 }
   0x8   :  { %1485 = vmatprep.subr.msk.mxu1 %vm221_vm0, %v1383_v5  ;;  %208 = vperm.xlu1 %1535, %v178_v35   ;;  %v1404_v43 = vld [vmem:[%s2023_s0 + $0x20] sm:$0xff]   ;;  %v1343_v48 = vunpack.c.l.bf16 %v1421_v32  ;;  %v1308_v49 = vunpack.c.h.bf16 %v1412_v41  ;;  %v1372_v50 = vunpack.c.h.bf16 %v1428_v42 }
   0x9   :  { %v1420_v44 = vld [vmem:[%s2023_s0 + $0xa0] sm:$0xff]   ;;  %1467 = vmatprep.mubr.msk.f32.mxu0 %vm221_vm0, %v1679_v40  ;;  %1515 = vmatprep.mubr.msk.f32.mxu1 %vm221_vm0, %v1679_v40 }
   0xa   :  { %1438 = vmatpush3.xpose.msk.msra.mxu0 %vm221_vm0, %v1287_v13  ;;  %218 = vperm.xlu0 %1534, %v180_v34  }
   0xb   :  { %1486 = vmatpush3.xpose.msk.msra.mxu1 %vm221_vm0, %v1351_v14  ;;  %1439 = vmatprep.subr.msk.mxu0 %vm221_vm0, %v1316_v15 }
   0xc   :  { %1487 = vmatprep.subr.msk.mxu1 %vm221_vm0, %v1380_v16  ;;  %198 = vperm.xlu1 %1535, %v176_v46  }
   0xe   :  { %1440 = vmatpush3.xpose.msk.msra.mxu0 %vm221_vm0, %v1284_v19  ;;  %193 = vperm.xlu0 %1534, %v175_v45  }
   0xf   :  { %1488 = vmatpush3.xpose.msk.msra.mxu1 %vm221_vm0, %v1348_v20  ;;  %1441 = vmatprep.subr.msk.mxu0 %vm221_vm0, %v1315_v21 }
  0x10   :  { %1489 = vmatprep.subr.msk.mxu1 %vm221_vm0, %v1379_v22 }
  0x12   :  { %1442 = vmatpush3.xpose.msk.msra.mxu0 %vm221_vm0, %v1283_v25 }
  0x13   :  { %1490 = vmatpush3.xpose.msk.msra.mxu1 %vm221_vm0, %v1347_v26  ;;  %1443 = vmatprep.subr.msk.mxu0 %vm221_vm0, %v1312_v29 }
  0x14   :  { %1491 = vmatprep.subr.msk.mxu1 %vm221_vm0, %v1376_v30 }
  0x16   :  { %1444 = vmatpush3.xpose.msk.msra.mxu0 %vm221_vm0, %v1280_v36 }
  0x17   :  { %1492 = vmatpush3.xpose.msk.msra.mxu1 %vm221_vm0, %v1344_v37  ;;  %1445 = vmatprep.subr.msk.mxu0 %vm221_vm0, %v1311_v38 }
  0x18   :  { %1493 = vmatprep.subr.msk.mxu1 %vm221_vm0, %v1375_v39 }
  0x19   :  { %13 = vsyncpa [#allocation4], 0  ;;  %v173_v51 = vld [vmem:[%s2025_s2] sm:$0xff]  ;;  %v174_v52 = vld [vmem:[%s2025_s2 + $0x8] sm:$0xff]  ;;  %v1276_v53 = vunpack.c.h.bf16 %v1404_v43  ;;  %v1340_v54 = vunpack.c.h.bf16 %v1420_v44  ;;  %v1307_v55 = vunpack.c.l.bf16 %v1412_v41  ;;  %v1371_v56 = vunpack.c.l.bf16 %v1428_v42  ;;  %s1564_s8 = smov [#allocation3]  }
  0x1a   :  { %1446 = vmatpush3.xpose.msk.msra.mxu0 %vm221_vm0, %v1279_v47  ;;  %v1411_v57 = vld [vmem:[%s2023_s0 + $0x58] sm:$0xff]   ;;  %183 = vperm.xlu0 %1534, %v173_v51   ;;  %v720_v59 = vld [vmem:[%s2027_s4] sm:$0xff]  ;;  %v721_v60 = vld [vmem:[%s2027_s4 + $0x8] sm:$0xff]  ;;  %v1275_v61 = vunpack.c.l.bf16 %v1404_v43  ;;  %v1339_v62 = vunpack.c.l.bf16 %v1420_v44  ;;  %vm788_vm1 = vcmask 523264   ;;  %s1157_s2 = sshll.u32 %s1564_s8, 4  ;;  %s1158_s2 = int_to_ptr.vmem [resolvable:$true] %s1157_s2 }
  0x1b   :  { %1494 = vmatpush3.xpose.msk.msra.mxu1 %vm221_vm0, %v1343_v48  ;;  %1447 = vmatprep.subr.msk.mxu0 %vm221_vm0, %v1308_v49  ;;  %v1427_v58 = vld [vmem:[%s2023_s0 + $0xd8] sm:$0xff]   ;;  %v1304_v63 = vunpack.c.h.bf16 %v1411_v57  ;;  %v722_v3 = vld [vmem:[%s2027_s4 + $0x10] sm:$0xff]  ;;  %v1303_v7 = vunpack.c.l.bf16 %v1411_v57  ;;  %v979_v12 = vld [vmem:[%s2028_s5] sm:$0xff]  ;;  %s1540_s9 = scalar_lea.vmem %s1158_s2, 64  ;;  %p1545_p1 = scmp.lt.s32.totalorder %s1158_s2, %s1158_s2 }
  0x1c   :  { %1495 = vmatprep.subr.msk.mxu1 %vm221_vm0, %v1372_v50  ;;  %188 = vperm.xlu1 %1535, %v174_v52   ;;  %v1368_v0 = vunpack.c.h.bf16 %v1427_v58  ;;  %v1403_v1 = vld [vmem:[%s2023_s0 + $0x18] sm:$0xff]   ;;  %v1367_v9 = vunpack.c.l.bf16 %v1427_v58  ;;  %v1410_v10 = vld [vmem:[%s2023_s0 + $0x50] sm:$0xff]   ;;  %v980_v13 = vld [vmem:[%s2028_s5 + $0x8] sm:$0xff]  ;;  %p1541_p0 = scmp.ne.s32.totalorder %s1158_s2, %s1540_s9  ;;  %p1546_p2 = scmp.lt.s32.totalorder %s1540_s9, %s1540_s9 }
  0x1d   :  { %v1419_v2 = vld [vmem:[%s2023_s0 + $0x98] sm:$0xff]   ;;  %v1272_v5 = vunpack.c.h.bf16 %v1403_v1  ;;  %v1426_v11 = vld [vmem:[%s2023_s0 + $0xd0] sm:$0xff]   ;;  %v1271_v14 = vunpack.c.l.bf16 %v1403_v1  ;;  %v1300_v16 = vunpack.c.h.bf16 %v1410_v10  ;;  %v724_v20 = vld [vmem:[%s2027_s4 + $0x20] sm:$0xff]  ;;  %v1299_v24 = vunpack.c.l.bf16 %v1410_v10 }
  0x1e   :  { %1448 = vmatpush3.xpose.msk.msra.mxu0 %vm221_vm0, %v1276_v53  ;;  %730 = vperm.xlu0 %1534, %v720_v59   ;;  %v723_v4 = vld [vmem:[%s2027_s4 + $0x18] sm:$0xff]  ;;  %v1336_v6 = vunpack.c.h.bf16 %v1419_v2  ;;  %v1335_v15 = vunpack.c.l.bf16 %v1419_v2  ;;  %v1364_v17 = vunpack.c.h.bf16 %v1426_v11  ;;  %v1402_v18 = vld [vmem:[%s2023_s0 + $0x10] sm:$0xff]   ;;  %v1363_v25 = vunpack.c.l.bf16 %v1426_v11  ;;  %v1409_v26 = vld [vmem:[%s2023_s0 + $0x48] sm:$0xff]   ;;  %p1547_p3 = por %p1546_p2, %p1545_p1 }
  0x1f   :  { %1496 = vmatpush3.xpose.msk.msra.mxu1 %vm221_vm0, %v1340_v54  ;;  %1449 = vmatprep.subr.msk.mxu0 %vm221_vm0, %v1307_v55  ;;  %v1418_v19 = vld [vmem:[%s2023_s0 + $0x90] sm:$0xff]   ;;  %v1268_v22 = vunpack.c.h.bf16 %v1402_v18  ;;  %v1425_v27 = vld [vmem:[%s2023_s0 + $0xc8] sm:$0xff]   ;;  %v982_v29 = vld [vmem:[%s2028_s5 + $0x18] sm:$0xff]  ;;  %v1267_v30 = vunpack.c.l.bf16 %v1402_v18  ;;  %v1296_v32 = vunpack.c.h.bf16 %v1409_v26  ;;  %v1295_v42 = vunpack.c.l.bf16 %v1409_v26 }
  0x20   :  { %1497 = vmatprep.subr.msk.mxu1 %vm221_vm0, %v1371_v56  ;;  %735 = vperm.xlu1 %1535, %v721_v60   ;;  %v981_v21 = vld [vmem:[%s2028_s5 + $0x10] sm:$0xff]  ;;  %v1332_v23 = vunpack.c.h.bf16 %v1418_v19  ;;  %v725_v28 = vld [vmem:[%s2027_s4 + $0x28] sm:$0xff]  ;;  %v1331_v31 = vunpack.c.l.bf16 %v1418_v19  ;;  %v1360_v34 = vunpack.c.h.bf16 %v1425_v27  ;;  %v983_v38 = vld [vmem:[%s2028_s5 + $0x20] sm:$0xff]  ;;  %v1359_v43 = vunpack.c.l.bf16 %v1425_v27  ;;  %p1548_p4 = pnand %p1547_p3, %p1541_p0 }
  0x21   :  { %v1401_v35 = vld [vmem:[%s2023_s0 + $0x8] sm:$0xff]   ;;  %v726_v37 = vld [vmem:[%s2027_s4 + $0x30] sm:$0xff]  ;;  %v1408_v44 = vld [vmem:[%s2023_s0 + $0x40] sm:$0xff]  }
  0x22   :  { %1450 = vmatpush3.xpose.msk.msra.mxu0 %vm221_vm0, %v1275_v61  ;;  %740 = vperm.xlu0 %1534, %v722_v3   ;;  %v1417_v36 = vld [vmem:[%s2023_s0 + $0x88] sm:$0xff]   ;;  %v1264_v39 = vunpack.c.h.bf16 %v1401_v35  ;;  %v1424_v45 = vld [vmem:[%s2023_s0 + $0xc0] sm:$0xff]   ;;  %v727_v46 = vld [vmem:[%s2027_s4 + $0x38] sm:$0xff]  ;;  %v1263_v48 = vunpack.c.l.bf16 %v1401_v35  ;;  %v1292_v50 = vunpack.c.h.bf16 %v1408_v44  ;;  %v1291_v58 = vunpack.c.l.bf16 %v1408_v44 }
  0x23   :  { %1498 = vmatpush3.xpose.msk.msra.mxu1 %vm221_vm0, %v1339_v62  ;;  %1451 = vmatprep.subr.msk.mxu0 %vm221_vm0, %v1304_v63  ;;  %v1328_v41 = vunpack.c.h.bf16 %v1417_v36  ;;  %v984_v47 = vld [vmem:[%s2028_s5 + $0x28] sm:$0xff]  ;;  %v1327_v49 = vunpack.c.l.bf16 %v1417_v36  ;;  %v1356_v51 = vunpack.c.h.bf16 %v1424_v45  ;;  %v1258_v52 = vld [vmem:[%s2023_s0] sm:$0xff]   ;;  %v985_v54 = vld [vmem:[%s2028_s5 + $0x30] sm:$0xff]  ;;  %v1355_v59 = vunpack.c.l.bf16 %v1424_v45 }
  0x24   :  { %1499 = vmatprep.subr.msk.mxu1 %vm221_vm0, %v1368_v0  ;;  %745 = vperm.xlu1 %1535, %v723_v4   ;;  %v1416_v53 = vld [vmem:[%s2023_s0 + $0x80] sm:$0xff]   ;;  %v986_v55 = vld [vmem:[%s2028_s5 + $0x38] sm:$0xff]  ;;  %v1260_v56 = vunpack.c.h.bf16 %v1258_v52  ;;  %v1259_v60 = vunpack.c.l.bf16 %v1258_v52  ;;  %v1388_v62 = vunpack.c.h.bf16 %v1666_v33  ;;  %v1432_v63 = vld [vmem:[%s2024_s1 + $0x8] sm:$0xff]  }
  0x25   :  { %v1324_v57 = vunpack.c.h.bf16 %v1416_v53  ;;  %v1323_v61 = vunpack.c.l.bf16 %v1416_v53  ;;  %v1391_v0 = vunpack.c.l.bf16 %v1432_v63  ;;  %v1392_v33 = vunpack.c.h.bf16 %v1432_v63  ;;  %v1433_v1 = vld [vmem:[%s2024_s1 + $0x10] sm:$0xff]   ;;  %v1434_v3 = vld [vmem:[%s2024_s1 + $0x18] sm:$0xff]  }
  0x26   :  { %1452 = vmatpush3.xpose.msk.msra.mxu0 %vm221_vm0, %v1272_v5  ;;  %989 = vperm.xlu0 %1534, %v979_v12   ;;  %v1396_v2 = vunpack.c.h.bf16 %v1433_v1  ;;  %v1399_v4 = vunpack.c.l.bf16 %v1434_v3  ;;  %v1400_v5 = vunpack.c.h.bf16 %v1434_v3 }
  0x27   :  { %1500 = vmatpush3.xpose.msk.msra.mxu1 %vm221_vm0, %v1336_v6  ;;  %1453 = vmatprep.subr.msk.mxu0 %vm221_vm0, %v1303_v7 }
  0x28   :  { %1501 = vmatprep.subr.msk.mxu1 %vm221_vm0, %v1367_v9  ;;  %994 = vperm.xlu1 %1535, %v980_v13  }
  0x2a   :  { %1454 = vmatpush3.xpose.msk.msra.mxu0 %vm221_vm0, %v1271_v14  ;;  %750 = vperm.xlu0 %1534, %v724_v20  }
  0x2b   :  { %1502 = vmatpush3.xpose.msk.msra.mxu1 %vm221_vm0, %v1335_v15  ;;  %1455 = vmatprep.subr.msk.mxu0 %vm221_vm0, %v1300_v16 }
  0x2c   :  { %1503 = vmatprep.subr.msk.mxu1 %vm221_vm0, %v1364_v17  ;;  %999 = vperm.xlu1 %1535, %v981_v21  }
  0x2e   :  { %1456 = vmatpush3.xpose.msk.msra.mxu0 %vm221_vm0, %v1268_v22  ;;  %755 = vperm.xlu0 %1534, %v725_v28  }
  0x2f   :  { %1504 = vmatpush3.xpose.msk.msra.mxu1 %vm221_vm0, %v1332_v23  ;;  %1457 = vmatprep.subr.msk.mxu0 %vm221_vm0, %v1299_v24 }
  0x30   :  { %1505 = vmatprep.subr.msk.mxu1 %vm221_vm0, %v1363_v25  ;;  %1004 = vperm.xlu1 %1535, %v982_v29  }
  0x32   :  { %1458 = vmatpush3.xpose.msk.msra.mxu0 %vm221_vm0, %v1267_v30  ;;  %760 = vperm.xlu0 %1534, %v726_v37  }
  0x33   :  { %1506 = vmatpush3.xpose.msk.msra.mxu1 %vm221_vm0, %v1331_v31  ;;  %1459 = vmatprep.subr.msk.mxu0 %vm221_vm0, %v1296_v32 }
  0x34   :  { %1507 = vmatprep.subr.msk.mxu1 %vm221_vm0, %v1360_v34  ;;  %1009 = vperm.xlu1 %1535, %v983_v38  }
  0x36   :  { %1460 = vmatpush3.xpose.msk.msra.mxu0 %vm221_vm0, %v1264_v39  ;;  %765 = vperm.xlu0 %1534, %v727_v46  }
  0x37   :  { %1508 = vmatpush3.xpose.msk.msra.mxu1 %vm221_vm0, %v1328_v41  ;;  %1461 = vmatprep.subr.msk.mxu0 %vm221_vm0, %v1295_v42 }
  0x38   :  { %1509 = vmatprep.subr.msk.mxu1 %vm221_vm0, %v1359_v43  ;;  %1014 = vperm.xlu1 %1535, %v984_v47  }
  0x3a   :  { %1462 = vmatpush3.xpose.msk.msra.mxu0 %vm221_vm0, %v1263_v48  ;;  %1019 = vperm.xlu0 %1534, %v985_v54  }
  0x3b   :  { %1510 = vmatpush3.xpose.msk.msra.mxu1 %vm221_vm0, %v1327_v49  ;;  %1463 = vmatprep.subr.msk.mxu0 %vm221_vm0, %v1292_v50 }
  0x3c   :  { %1511 = vmatprep.subr.msk.mxu1 %vm221_vm0, %v1356_v51  ;;  %1024 = vperm.xlu1 %1535, %v986_v55  }
  0x3e   :  { %1464 = vmatpush3.xpose.msk.msra.mxu0 %vm221_vm0, %v1260_v56 }
  0x3f   :  { %1512 = vmatpush3.xpose.msk.msra.mxu1 %vm221_vm0, %v1324_v57  ;;  %1465 = vmatprep.subr.msk.mxu0 %vm221_vm0, %v1291_v58 }
  0x40   :  { %1513 = vmatprep.subr.msk.mxu1 %vm221_vm0, %v1355_v59 }
  0x42   :  { %1466 = vmatpush3.xpose.msk.msra.mxu0 %vm221_vm0, %v1259_v60 }
  0x43   :  { %1514 = vmatpush3.xpose.msk.msra.mxu1 %vm221_vm0, %v1323_v61 }
  0x45   :  { %1468 = vmatmul.mubr.msk.f32.vlgmr.msra.gmra.mxu0 %vm221_vm0, %v1679_v40 }
  0x46   :  { %1516 = vmatmul.mubr.msk.f32.vlgmr.msra.gmra.mxu1 %vm221_vm0, %v1679_v40  ;;  %1469 = vmatprep.mubr.msk.f32.mxu0 %vm221_vm0, %v1388_v62  ;;  %v1395_v40 = vunpack.c.l.bf16 %v1433_v1 }
  0x47   :  { %1517 = vmatprep.mubr.msk.f32.mxu1 %vm221_vm0, %v1388_v62 }
  0x49   :  { %1470 = vmatmul.mubr.msk.f32.gmra.mxu0 %vm221_vm0, %v1388_v62 }
  0x4a   :  { %1518 = vmatmul.mubr.msk.f32.gmra.mxu1 %vm221_vm0, %v1388_v62  ;;  %1471 = vmatprep.mubr.msk.f32.mxu0 %vm221_vm0, %v1391_v0 }
  0x4b   :  { %1519 = vmatprep.mubr.msk.f32.mxu1 %vm221_vm0, %v1391_v0 }
  0x4d   :  { %1472 = vmatmul.mubr.msk.f32.gmra.mxu0 %vm221_vm0, %v1391_v0 }
  0x4e   :  { %1520 = vmatmul.mubr.msk.f32.gmra.mxu1 %vm221_vm0, %v1391_v0  ;;  %1473 = vmatprep.mubr.msk.f32.mxu0 %vm221_vm0, %v1392_v33 }
  0x4f   :  { %1521 = vmatprep.mubr.msk.f32.mxu1 %vm221_vm0, %v1392_v33 }
  0x51   :  { %1474 = vmatmul.mubr.msk.f32.gmra.mxu0 %vm221_vm0, %v1392_v33 }
  0x52   :  { %1522 = vmatmul.mubr.msk.f32.gmra.mxu1 %vm221_vm0, %v1392_v33  ;;  %1475 = vmatprep.mubr.msk.f32.mxu0 %vm221_vm0, %v1395_v40 }
  0x53   :  { %1523 = vmatprep.mubr.msk.f32.mxu1 %vm221_vm0, %v1395_v40 }
  0x55   :  { %1476 = vmatmul.mubr.msk.f32.gmra.mxu0 %vm221_vm0, %v1395_v40 }
  0x56   :  { %1524 = vmatmul.mubr.msk.f32.gmra.mxu1 %vm221_vm0, %v1395_v40  ;;  %1477 = vmatprep.mubr.msk.f32.mxu0 %vm221_vm0, %v1396_v2 }
  0x57   :  { %1525 = vmatprep.mubr.msk.f32.mxu1 %vm221_vm0, %v1396_v2 }
  0x59   :  { %1478 = vmatmul.mubr.msk.f32.gmra.mxu0 %vm221_vm0, %v1396_v2 }
  0x5a   :  { %1526 = vmatmul.mubr.msk.f32.gmra.mxu1 %vm221_vm0, %v1396_v2  ;;  %1479 = vmatprep.mubr.msk.f32.mxu0 %vm221_vm0, %v1399_v4 }
  0x5b   :  { %1527 = vmatprep.mubr.msk.f32.mxu1 %vm221_vm0, %v1399_v4 }
  0x5d   :  { %1480 = vmatmul.mubr.msk.f32.gmra.mxu0 %vm221_vm0, %v1399_v4 }
  0x5e   :  { %1528 = vmatmul.mubr.msk.f32.gmra.mxu1 %vm221_vm0, %v1399_v4  ;;  %1481 = vmatprep.mubr.msk.f32.mxu0 %vm221_vm0, %v1400_v5 }
  0x5f   :  { %1529 = vmatprep.mubr.msk.f32.mxu1 %vm221_vm0, %v1400_v5 }
  0x61   :  { %1482 = vmatmul.mubr.msk.f32.gmra.mxu0 %vm221_vm0, %v1400_v5 }
  0x62   :  { %1530 = vmatmul.mubr.msk.f32.gmra.mxu1 %vm221_vm0, %v1400_v5  ;;  %833 = vmatprep.mubr.bf16.mxu0 %v1562_v8 }
  0x63   :  { %906 = vmatprep.mubr.bf16.mxu1 %v1562_v8 }
  0x7f   :  { %v1903_v16 = vpop.permute.xlu1 %203 }
  0x81   :  { %v214_v15 = vpop.permute.xlu0 %213 }
  0x83   :  { %v209_v24 = vpop.permute.xlu1 %208 }
  0x85   :  { %v219_v23 = vpop.permute.xlu0 %218 }
  0x87   :  { %v199_v32 = vpop.permute.xlu1 %198 }
  0x89   :  { %v1909_v31 = vpop.permute.xlu0 %193 }
  0x95   :  { %v1911_v41 = vpop.permute.xlu0 %183 }
  0x97   :  { %v1913_v42 = vpop.permute.xlu1 %188 }
 0x105   :  { %v1895_v6 = vpop.f32.mrf.mxu0 }
 0x106   :  { %v1897_v7 = vpop.f32.mrf.mxu1 }
 0x107   :  { %v506_v9 = vpop.f32.mrf.mxu0 }
 0x108   :  { %v619_v10 = vpop.f32.mrf.mxu1  ;;  %v1916_v43 = vadd.f32 %v506_v9, %v1911_v41 }
 0x109   :  { %v1899_v11 = vpop.f32.mrf.mxu0  ;;  %v1919_v44 = vadd.f32 %v619_v10, %v1911_v41 }
 0x10a   :  { %v1901_v12 = vpop.f32.mrf.mxu1 }
 0x10b   :  { %v512_v13 = vpop.f32.mrf.mxu0 }
 0x10c   :  { %v625_v14 = vpop.f32.mrf.mxu1  ;;  %v1922_v45 = vadd.f32 %v512_v13, %v1913_v42 }
 0x10d   :  { %v1905_v17 = vpop.f32.mrf.mxu0  ;;  %v1925_v46 = vadd.f32 %v625_v14, %v1913_v42 }
 0x10e   :  { %v1907_v18 = vpop.f32.mrf.mxu1 }
 0x10f   :  { %v518_v19 = vpop.f32.mrf.mxu0 }
 0x110   :  { %v631_v20 = vpop.f32.mrf.mxu1  ;;  %v1928_v49 = vadd.f32 %v518_v19, %v1909_v31 }
 0x111   :  { %v522_v21 = vpop.f32.mrf.mxu0  ;;  %v1931_v50 = vadd.f32 %v631_v20, %v1909_v31 }
 0x112   :  { %v635_v22 = vpop.f32.mrf.mxu1  ;;  %v1933_v51 = vadd.f32 %v522_v21, %v199_v32 }
 0x113   :  { %v524_v25 = vpop.f32.mrf.mxu0  ;;  %v1935_v52 = vadd.f32 %v635_v22, %v199_v32 }
 0x114   :  { %v637_v26 = vpop.f32.mrf.mxu1  ;;  %v1937_v53 = vadd.f32 %v524_v25, %v199_v32 }
 0x115   :  { %v528_v27 = vpop.f32.mrf.mxu0  ;;  %v1939_v54 = vadd.f32 %v637_v26, %v199_v32 }
 0x116   :  { %v641_v28 = vpop.f32.mrf.mxu1  ;;  %v529_v26 = vadd.f32 %v528_v27, %v1903_v16  ;;  %v630_v27 = vadd.f32 %v1907_v18, %v1909_v31  ;;  %v678_v18 = vmax.f32 %v1935_v52, 0.0  ;;  %v667_v52 = vmax.f32 %v1919_v44, 0.0  ;;  %v1537_v44 = vld [vmem:[%s2026_s3 + $0x8] sm:$0xff]  }
 0x117   :  { %v530_v29 = vpop.f32.mrf.mxu0 }
 0x118   :  { %v643_v30 = vpop.f32.mrf.mxu1  ;;  %v531_v63 = vadd.f32 %v530_v29, %v1903_v16  ;;  %v642_v29 = vadd.f32 %v641_v28, %v1903_v16  ;;  %v680_v28 = vmax.f32 %v529_v26, 0.0 }
 0x119   :  { %v534_v34 = vpop.f32.mrf.mxu0  ;;  %v644_v0 = vadd.f32 %v643_v30, %v1903_v16  ;;  %v517_v16 = vadd.f32 %v1905_v17, %v1909_v31  ;;  %v676_v17 = vmax.f32 %v1933_v51, 0.0  ;;  %v665_v51 = vmax.f32 %v1916_v43, 0.0  ;;  %v1536_v43 = vld [vmem:[%s2026_s3] sm:$0xff]  }
 0x11a   :  { %v647_v35 = vpop.f32.mrf.mxu1  ;;  %v535_v3 = vadd.f32 %v534_v34, %v209_v24  ;;  %v681_v32 = vmax.f32 %v531_v63, 0.0 }
 0x11b   :  { %v536_v36 = vpop.f32.mrf.mxu0  ;;  %v648_v4 = vadd.f32 %v647_v35, %v209_v24 }
 0x11c   :  { %v649_v37 = vpop.f32.mrf.mxu1  ;;  %v537_v55 = vadd.f32 %v536_v36, %v209_v24  ;;  %v683_v36 = vmax.f32 %v644_v0, 0.0  ;;  %v684_v35 = vmax.f32 %v535_v3, 0.0  ;;  %v1539_v3 = vld [vmem:[%s2026_s3 + $0x18] sm:$0xff]  }
 0x11d   :  { %v540_v38 = vpop.f32.mrf.mxu0  ;;  %v650_v56 = vadd.f32 %v649_v37, %v209_v24 }
 0x11e   :  { %v653_v39 = vpop.f32.mrf.mxu1  ;;  %v541_v33 = vadd.f32 %v540_v38, %v214_v15  ;;  %v685_v10 = vmax.f32 %v537_v55, 0.0  ;;  %v712_v31 = vpack.c.bf16 %v684_v35, %v680_v28 }
 0x11f   :  { %v542_v47 = vpop.f32.mrf.mxu0  ;;  %v654_v1 = vadd.f32 %v653_v39, %v214_v15  ;;  %v687_v13 = vmax.f32 %v650_v56, 0.0  ;;  %v677_v39 = vmax.f32 %v1937_v53, 0.0  ;;  %v682_v56 = vmax.f32 %v642_v29, 0.0 }
 0x120   :  { %v655_v48 = vpop.f32.mrf.mxu1  ;;  %v543_v59 = vadd.f32 %v542_v47, %v214_v15  ;;  %v688_v30 = vmax.f32 %v541_v33, 0.0  ;;  %v679_v47 = vmax.f32 %v1939_v54, 0.0  ;;  %v624_v53 = vadd.f32 %v1901_v12, %v1913_v42 }
 0x121   :  { %v546_v57 = vpop.f32.mrf.mxu0  ;;  %v656_v60 = vadd.f32 %v655_v48, %v214_v15  ;;  %v690_v15 = vmax.f32 %v654_v1, 0.0  ;;  %v713_v48 = vpack.c.bf16 %v685_v10, %v681_v32  ;;  %v715_v55 = vpack.c.bf16 %v687_v13, %v683_v36 }
 0x122   :  { %v659_v58 = vpop.f32.mrf.mxu1  ;;  %v547_v61 = vadd.f32 %v546_v57, %v219_v23  ;;  %v689_v20 = vmax.f32 %v543_v59, 0.0  ;;  %v511_v57 = vadd.f32 %v1899_v11, %v1913_v42  ;;  %v673_v54 = vmax.f32 %v1928_v49, 0.0 }
 0x123   :  { %v660_v62 = vadd.f32 %v659_v58, %v219_v23  ;;  %v548_v40 = vpop.f32.mrf.mxu0  ;;  %v691_v21 = vmax.f32 %v656_v60, 0.0  ;;  %v675_v58 = vmax.f32 %v1931_v50, 0.0  ;;  %v669_v60 = vmax.f32 %v1922_v45, 0.0 }
 0x124   :  { %v661_v2 = vpop.f32.mrf.mxu1  ;;  %v549_v5 = vadd.f32 %v548_v40, %v219_v23  ;;  %v692_v14 = vmax.f32 %v547_v61, 0.0  ;;  %v671_v61 = vmax.f32 %v1925_v46, 0.0  ;;  %v709_v11 = vpack.c.bf16 %v677_v39, %v673_v54 }
 0x125   :  { %v662_v9 = vadd.f32 %v661_v2, %v219_v23  ;;  %v694_v19 = vmax.f32 %v660_v62, 0.0  ;;  %v686_v23 = vmax.f32 %v648_v4, 0.0  ;;  %v711_v62 = vpack.c.bf16 %v679_v47, %v675_v58  ;;  %v1538_v2 = vld [vmem:[%s2026_s3 + $0x10] sm:$0xff]   ;;  %v731_v4 = vpop.permute.xlu0 %730 }
 0x126   :  { %v693_v22 = vmax.f32 %v549_v5, 0.0  ;;  %v716_v37 = vpack.c.bf16 %v692_v14, %v688_v30  ;;  %v505_v12 = vadd.f32 %v1895_v6, %v1911_v41  ;;  %v618_v42 = vadd.f32 %v1897_v7, %v1911_v41  ;;  %v736_v5 = vpop.permute.xlu1 %735 }
 0x127   :  { %v695_v25 = vmax.f32 %v662_v9, 0.0  ;;  %v718_v38 = vpack.c.bf16 %v694_v19, %v690_v15  ;;  %v714_v59 = vpack.c.bf16 %v686_v23, %v682_v56  ;;  %v672_v49 = vmax.f32 %v517_v16, 0.0 }
 0x128   :  { %v717_v34 = vpack.c.bf16 %v693_v22, %v689_v20  ;;  %v674_v50 = vmax.f32 %v630_v27, 0.0  ;;  %v668_v45 = vmax.f32 %v511_v57, 0.0  ;;  %v670_v46 = vmax.f32 %v624_v53, 0.0 }
 0x129   :  { %v719_v24 = vpack.c.bf16 %v695_v25, %v691_v21  ;;  %v708_v63 = vpack.c.bf16 %v676_v17, %v672_v49  ;;  %v705_v33 = vpack.c.bf16 %v669_v60, %v665_v51  ;;  %v707_v1 = vpack.c.bf16 %v671_v61, %v667_v52  ;;  %v741_v9 = vpop.permute.xlu0 %740 }
 0x12a   :  { %809 = vmatprep.subr.bf16.mxu0 %v717_v34  ;;  %v710_v0 = vpack.c.bf16 %v678_v18, %v674_v50  ;;  %v664_v6 = vmax.f32 %v505_v12, 0.0  ;;  %v666_v40 = vmax.f32 %v618_v42, 0.0  ;;  %v1993_v10 = vpop.permute.xlu1 %745 }
 0x12b   :  { %882 = vmatprep.subr.bf16.mxu1 %v719_v24  ;;  %810 = vmatpush1.bf16.msra.mxu0 %v716_v37 }
 0x12c   :  { %883 = vmatpush1.bf16.msra.mxu1 %v718_v38  ;;  %811 = vmatprep.subr.bf16.mxu0 %v713_v48  ;;  %v704_v7 = vpack.c.bf16 %v668_v45, %v664_v6  ;;  %v706_v41 = vpack.c.bf16 %v670_v46, %v666_v40 }
 0x12d   :  { %884 = vmatprep.subr.bf16.mxu1 %v715_v55  ;;  %v990_v13 = vpop.permute.xlu0 %989 }
 0x12e   :  { %v995_v20 = vpop.permute.xlu1 %994 }
 0x12f   :  { %812 = vmatpush1.bf16.msra.mxu0 %v712_v31 }
 0x130   :  { %885 = vmatpush1.bf16.msra.mxu1 %v714_v59  ;;  %813 = vmatprep.subr.bf16.mxu0 %v709_v11 }
 0x131   :  { %886 = vmatprep.subr.bf16.mxu1 %v711_v62  ;;  %v1995_v26 = vpop.permute.xlu0 %750 }
 0x132   :  { %v1000_v38 = vpop.permute.xlu1 %999 }
 0x133   :  { %814 = vmatpush1.bf16.msra.mxu0 %v708_v63 }
 0x134   :  { %887 = vmatpush1.bf16.msra.mxu1 %v710_v0  ;;  %815 = vmatprep.subr.bf16.mxu0 %v705_v33 }
 0x135   :  { %888 = vmatprep.subr.bf16.mxu1 %v707_v1  ;;  %v1997_v57 = vpop.permute.xlu0 %755 }
 0x136   :  { %v1005_v46 = vpop.permute.xlu1 %1004 }
 0x137   :  { %816 = vmatpush1.bf16.msra.mxu0 %v704_v7 }
 0x138   :  { %889 = vmatpush1.bf16.msra.mxu1 %v706_v41 }
 0x13a   :  { %1249 = vmatmul.mubr.msk.bf16.vlgmr.msra.gmra.mxu0 %vm788_vm1, %v1536_v43 }
 0x13b   :  { %1253 = vmatmul.mubr.msk.bf16.vlgmr.msra.gmra.mxu1 %vm788_vm1, %v1536_v43  ;;  %843 = vmatprep.mubr.bf16.mxu0 %v1562_v8 }
 0x13c   :  { %916 = vmatprep.mubr.bf16.mxu1 %v1562_v8 }
 0x142   :  { %1250 = vmatmul.mubr.msk.bf16.gmra.mxu0 %vm788_vm1, %v1537_v44 }
 0x143   :  { %1254 = vmatmul.mubr.msk.bf16.gmra.mxu1 %vm788_vm1, %v1537_v44  ;;  %853 = vmatprep.mubr.bf16.mxu0 %v1562_v8 }
 0x144   :  { %926 = vmatprep.mubr.bf16.mxu1 %v1562_v8 }
 0x14a   :  { %1251 = vmatmul.mubr.msk.bf16.gmra.mxu0 %vm788_vm1, %v1538_v2 }
 0x14b   :  { %1255 = vmatmul.mubr.msk.bf16.gmra.mxu1 %vm788_vm1, %v1538_v2  ;;  %863 = vmatprep.mubr.bf16.mxu0 %v1562_v8  ;;  %v2001_v2 = vpop.permute.xlu0 %760 }
 0x14c   :  { %936 = vmatprep.mubr.bf16.mxu1 %v1562_v8 }
 0x152   :  { %1252 = vmatmul.mubr.msk.bf16.gmra.mxu0 %vm788_vm1, %v1539_v3 }
 0x153   :  { %1256 = vmatmul.mubr.msk.bf16.gmra.mxu1 %vm788_vm1, %v1539_v3 }
 0x1fa   :  { %v835_v14 = vpop.f32.mrf.mxu0 }
 0x1fb   :  { %v908_v19 = vpop.f32.mrf.mxu1  ;;  %v836_v21 = vadd.f32 %v835_v14, %v731_v4 }
 0x1fc   :  { %v909_v22 = vadd.f32 %v908_v19, %v731_v4  ;;  %v837_v8 = vpop.f32.mrf.mxu0 }
 0x1fd   :  { %v910_v25 = vpop.f32.mrf.mxu1  ;;  %v838_v29 = vadd.f32 %v837_v8, %v731_v4  ;;  %v947_v36 = vmax.f32 %v836_v21, 0.0 }
 0x1fe   :  { %v911_v30 = vadd.f32 %v910_v25, %v731_v4  ;;  %v839_v15 = vpop.f32.mrf.mxu0  ;;  %v949_v34 = vmax.f32 %v909_v22, 0.0 }
 0x1ff   :  { %v912_v32 = vpop.f32.mrf.mxu1  ;;  %v840_v24 = vadd.f32 %v839_v15, %v736_v5  ;;  %v948_v48 = vmax.f32 %v838_v29, 0.0  ;;  %v1027_v18 = vmul.f32 %v990_v13, %v947_v36 }
 0x200   :  { %v913_v35 = vadd.f32 %v912_v32, %v736_v5  ;;  %v841_v23 = vpop.f32.mrf.mxu0  ;;  %v950_v55 = vmax.f32 %v911_v30, 0.0  ;;  %v1029_v31 = vmul.f32 %v990_v13, %v949_v34 }
 0x201   :  { %v914_v37 = vpop.f32.mrf.mxu1  ;;  %v842_v39 = vadd.f32 %v841_v23, %v736_v5  ;;  %v951_v16 = vmax.f32 %v840_v24, 0.0  ;;  %v1028_v42 = vmul.f32 %v990_v13, %v948_v48  ;;  %v1010_v23 = vpop.permute.xlu1 %1009 }
 0x202   :  { %v915_v47 = vadd.f32 %v914_v37, %v736_v5  ;;  %v953_v27 = vmax.f32 %v913_v35, 0.0  ;;  %v845_v28 = vpop.f32.mrf.mxu0  ;;  %v1030_v49 = vmul.f32 %v990_v13, %v950_v55 }
 0x203   :  { %v918_v56 = vpop.f32.mrf.mxu1  ;;  %v952_v53 = vmax.f32 %v842_v39, 0.0  ;;  %v846_v58 = vadd.f32 %v845_v28, %v741_v9  ;;  %v1031_v61 = vmul.f32 %v995_v20, %v951_v16 }
 0x204   :  { %v954_v54 = vmax.f32 %v915_v47, 0.0  ;;  %v919_v17 = vadd.f32 %v918_v56, %v741_v9  ;;  %v847_v59 = vpop.f32.mrf.mxu0  ;;  %v1033_v11 = vmul.f32 %v995_v20, %v953_v27  ;;  %v766_v56 = vpop.permute.xlu0 %765 }
 0x205   :  { %v920_v60 = vpop.f32.mrf.mxu1  ;;  %v955_v62 = vmax.f32 %v846_v58, 0.0  ;;  %v848_v50 = vadd.f32 %v847_v59, %v741_v9  ;;  %v1032_v63 = vmul.f32 %v995_v20, %v952_v53  ;;  %v1059_v3 = vadd.f32 %v1031_v61, %v1027_v18 }
 0x206   :  { %v957_v12 = vmax.f32 %v919_v17, 0.0  ;;  %v921_v51 = vadd.f32 %v920_v60, %v741_v9  ;;  %v849_v52 = vpop.f32.mrf.mxu0  ;;  %v1034_v0 = vmul.f32 %v995_v20, %v954_v54  ;;  %v1085_v4 = vadd.f32 %v1033_v11, %v1029_v31 }
 0x207   :  { %v922_v45 = vpop.f32.mrf.mxu1  ;;  %v1035_v33 = vmul.f32 %v1000_v38, %v955_v62  ;;  %v956_v6 = vmax.f32 %v848_v50, 0.0  ;;  %v850_v7 = vadd.f32 %v849_v52, %v1993_v10  ;;  %v1072_v15 = vadd.f32 %v1032_v63, %v1028_v42  ;;  %v1015_v63 = vpop.permute.xlu1 %1014 }
 0x208   :  { %v1037_v1 = vmul.f32 %v1000_v38, %v957_v12  ;;  %v958_v40 = vmax.f32 %v921_v51, 0.0  ;;  %v923_v41 = vadd.f32 %v922_v45, %v1993_v10  ;;  %v851_v43 = vpop.f32.mrf.mxu0  ;;  %v1098_v32 = vadd.f32 %v1034_v0, %v1030_v49 }
 0x209   :  { %v924_v44 = vpop.f32.mrf.mxu1  ;;  %v852_v5 = vadd.f32 %v851_v43, %v1993_v10  ;;  %v1036_v13 = vmul.f32 %v1000_v38, %v956_v6  ;;  %v959_v19 = vmax.f32 %v850_v7, 0.0  ;;  %v1060_v36 = vadd.f32 %v1059_v3, %v1035_v33 }
 0x20a   :  { %v925_v9 = vadd.f32 %v924_v44, %v1993_v10  ;;  %v1038_v14 = vmul.f32 %v1000_v38, %v958_v40  ;;  %v961_v20 = vmax.f32 %v923_v41, 0.0  ;;  %v855_v21 = vpop.f32.mrf.mxu0  ;;  %v1086_v34 = vadd.f32 %v1085_v4, %v1037_v1 }
 0x20b   :  { %v928_v22 = vpop.f32.mrf.mxu1  ;;  %v960_v8 = vmax.f32 %v852_v5, 0.0  ;;  %v856_v29 = vadd.f32 %v855_v21, %v1995_v26  ;;  %v1039_v10 = vmul.f32 %v1005_v46, %v959_v19  ;;  %v1073_v47 = vadd.f32 %v1072_v15, %v1036_v13 }
 0x20c   :  { %v962_v25 = vmax.f32 %v925_v9, 0.0  ;;  %v929_v30 = vadd.f32 %v928_v22, %v1995_v26  ;;  %v857_v24 = vpop.f32.mrf.mxu0  ;;  %v1041_v37 = vmul.f32 %v1005_v46, %v961_v20  ;;  %v1099_v48 = vadd.f32 %v1098_v32, %v1038_v14 }
 0x20d   :  { %v930_v35 = vpop.f32.mrf.mxu1  ;;  %v963_v38 = vmax.f32 %v856_v29, 0.0  ;;  %v858_v55 = vadd.f32 %v857_v24, %v1995_v26  ;;  %v1040_v53 = vmul.f32 %v1005_v46, %v960_v8  ;;  %v1061_v62 = vadd.f32 %v1060_v36, %v1039_v10 }
 0x20e   :  { %v965_v39 = vmax.f32 %v929_v30, 0.0  ;;  %v931_v16 = vadd.f32 %v930_v35, %v1995_v26  ;;  %v859_v27 = vpop.f32.mrf.mxu0  ;;  %v1042_v54 = vmul.f32 %v1005_v46, %v962_v25  ;;  %v1087_v12 = vadd.f32 %v1086_v34, %v1041_v37 }
 0x20f   :  { %v932_v28 = vpop.f32.mrf.mxu1  ;;  %v1043_v58 = vmul.f32 %v1010_v23, %v963_v38  ;;  %v964_v18 = vmax.f32 %v858_v55, 0.0  ;;  %v860_v59 = vadd.f32 %v859_v27, %v1997_v57  ;;  %v1074_v40 = vadd.f32 %v1073_v47, %v1040_v53 }
 0x210   :  { %v1045_v17 = vmul.f32 %v1010_v23, %v965_v39  ;;  %v966_v31 = vmax.f32 %v931_v16, 0.0  ;;  %v933_v60 = vadd.f32 %v932_v28, %v1997_v57  ;;  %v861_v61 = vpop.f32.mrf.mxu0  ;;  %v1100_v7 = vadd.f32 %v1099_v48, %v1042_v54  ;;  %v1025_v16 = vpop.permute.xlu1 %1024 }
 0x211   :  { %v934_v11 = vpop.f32.mrf.mxu1  ;;  %v862_v42 = vadd.f32 %v861_v61, %v1997_v57  ;;  %v1044_v49 = vmul.f32 %v1010_v23, %v964_v18  ;;  %v967_v51 = vmax.f32 %v860_v59, 0.0  ;;  %v1062_v41 = vadd.f32 %v1061_v62, %v1043_v58 }
 0x212   :  { %v935_v26 = vadd.f32 %v934_v11, %v1997_v57  ;;  %v1046_v50 = vmul.f32 %v1010_v23, %v966_v31  ;;  %v969_v52 = vmax.f32 %v933_v60, 0.0  ;;  %v865_v45 = vpop.f32.mrf.mxu0  ;;  %v1088_v43 = vadd.f32 %v1087_v12, %v1045_v17  ;;  %v1020_v57 = vpop.permute.xlu0 %1019 }
 0x213   :  { %v938_v46 = vpop.f32.mrf.mxu1  ;;  %v968_v0 = vmax.f32 %v862_v42, 0.0  ;;  %v866_v1 = vadd.f32 %v865_v45, %v2001_v2  ;;  %v1047_v4 = vmul.f32 %v1015_v63, %v967_v51  ;;  %v1075_v14 = vadd.f32 %v1074_v40, %v1044_v49 }
 0x214   :  { %v970_v33 = vmax.f32 %v935_v26, 0.0  ;;  %v939_v6 = vadd.f32 %v938_v46, %v2001_v2  ;;  %v867_v44 = vpop.f32.mrf.mxu0  ;;  %v1049_v5 = vmul.f32 %v1015_v63, %v969_v52  ;;  %v1101_v19 = vadd.f32 %v1100_v7, %v1046_v50 }
 0x215   :  { %v940_v3 = vpop.f32.mrf.mxu1  ;;  %v971_v9 = vmax.f32 %v866_v1, 0.0  ;;  %v868_v20 = vadd.f32 %v867_v44, %v2001_v2  ;;  %v1048_v25 = vmul.f32 %v1015_v63, %v968_v0  ;;  %v1063_v10 = vadd.f32 %v1062_v41, %v1047_v4 }
 0x216   :  { %v973_v13 = vmax.f32 %v939_v6, 0.0  ;;  %v941_v21 = vadd.f32 %v940_v3, %v2001_v2  ;;  %v869_v22 = vpop.f32.mrf.mxu0  ;;  %v1050_v29 = vmul.f32 %v1015_v63, %v970_v33  ;;  %v1089_v37 = vadd.f32 %v1088_v43, %v1049_v5 }
 0x217   :  { %v942_v8 = vpop.f32.mrf.mxu1  ;;  %v1051_v30 = vmul.f32 %v1020_v57, %v971_v9  ;;  %v972_v32 = vmax.f32 %v868_v20, 0.0  ;;  %v870_v34 = vadd.f32 %v869_v22, %v766_v56  ;;  %v1076_v27 = vadd.f32 %v1075_v14, %v1048_v25 }
 0x218   :  { %v1053_v15 = vmul.f32 %v1020_v57, %v973_v13  ;;  %v974_v36 = vmax.f32 %v941_v21, 0.0  ;;  %v943_v24 = vadd.f32 %v942_v8, %v766_v56  ;;  %v871_v35 = vpop.f32.mrf.mxu0  ;;  %v1102_v28 = vadd.f32 %v1101_v19, %v1050_v29 }
 0x219   :  { %v944_v23 = vpop.f32.mrf.mxu1  ;;  %v872_v38 = vadd.f32 %v871_v35, %v766_v56  ;;  %v1052_v47 = vmul.f32 %v1020_v57, %v972_v32  ;;  %v975_v55 = vmax.f32 %v870_v34, 0.0  ;;  %v1064_v58 = vadd.f32 %v1063_v10, %v1051_v30 }
 0x21a   :  { %v945_v39 = vadd.f32 %v944_v23, %v766_v56  ;;  %v1054_v48 = vmul.f32 %v1020_v57, %v974_v36  ;;  %v977_v2 = vmax.f32 %v943_v24, 0.0  ;;  %v1090_v17 = vadd.f32 %v1089_v37, %v1053_v15 }
 0x21b   :  { %v976_v53 = vmax.f32 %v872_v38, 0.0  ;;  %v1055_v18 = vmul.f32 %v1025_v16, %v975_v55  ;;  %v1077_v59 = vadd.f32 %v1076_v27, %v1052_v47  ;;  %v1563_v1 = vmov 1966171168  }
 0x21c   :  { %v978_v54 = vmax.f32 %v945_v39, 0.0  ;;  %v1057_v31 = vmul.f32 %v1025_v16, %v977_v2  ;;  %v1103_v60 = vadd.f32 %v1102_v28, %v1054_v48  ;;  %v1124_v6 = vunpack.c.l.s4 %v1563_v1 }
 0x21d   :  { %v1056_v61 = vmul.f32 %v1025_v16, %v976_v53  ;;  %v1065_v62 = vadd.f32 %v1064_v58, %v1055_v18  ;;  %v1126_v40 = vlaneseq  ;;  %v1112_v22 = vstv %s2029_s6 }
 0x21e   :  { %v1058_v11 = vmul.f32 %v1025_v16, %v978_v54  ;;  %v1091_v12 = vadd.f32 %v1090_v17, %v1057_v31  ;;  %v1125_v9 = vunpack.c.0.s8 %v1124_v6 }
 0x21f   :  { %v1078_v56 = vadd.f32 %v1077_v59, %v1056_v61  ;;  %v1066_v26 = vrot.slane %v1065_v62, 4  ;;  %v1127_v13 = vshrl.u32 %v1126_v40, 7  ;;  %vm1148_vm2 = vcmp.lt.s32.totalorder %v1126_v40, 512 }
 0x220   :  { %v1104_v42 = vadd.f32 %v1103_v60, %v1058_v11  ;;  %v1092_v49 = vrot.slane %v1091_v12, 4 }
 0x221   :  { %v1079_v50 = vrot.slane %v1078_v56, 4  ;;  %v1067_v52 = vadd.f32 %v1066_v26, %v1065_v62  ;;  %v1128_v29 = vsub.s32 %v1125_v9, %v1127_v13 }
 0x222   :  { %v1105_v51 = vrot.slane %v1104_v42, 4  ;;  %v1093_v45 = vadd.f32 %v1092_v49, %v1091_v12 }
 0x223   :  { %v1080_v46 = vadd.f32 %v1079_v50, %v1078_v56  ;;  %v1068_v0 = vrot.slane %v1067_v52, 2 }
 0x224   :  { %v1106_v63 = vadd.f32 %v1105_v51, %v1104_v42  ;;  %v1094_v33 = vrot.slane %v1093_v45, 2 }
 0x225   :  { %v1081_v7 = vrot.slane %v1080_v46, 2  ;;  %v1069_v43 = vadd.f32 %v1068_v0, %v1067_v52 }
 0x226   :  { %v1107_v41 = vrot.slane %v1106_v63, 2  ;;  %v1095_v44 = vadd.f32 %v1094_v33, %v1093_v45 }
 0x227   :  { %v1082_v3 = vadd.f32 %v1081_v7, %v1080_v46  ;;  %v1070_v4 = vrot.slane %v1069_v43, 1 }
 0x228   :  { %v1108_v57 = vadd.f32 %v1107_v41, %v1106_v63  ;;  %v1096_v5 = vrot.slane %v1095_v44, 1 }
 0x229   :  { %v1083_v14 = vrot.slane %v1082_v3, 1  ;;  %v1071_v20 = vadd.f32 %v1070_v4, %v1069_v43 }
 0x22a   :  { %v1109_v19 = vrot.slane %v1108_v57, 1  ;;  %v1097_v21 = vadd.f32 %v1096_v5, %v1095_v44 }
 0x22b   :  { %v1084_v8 = vadd.f32 %v1083_v14, %v1082_v3  ;;  %v1113_v30 = vadd.f32 %v1112_v22, %v1071_v20 }
 0x22c   :  { %v1110_v25 = vadd.f32 %v1109_v19, %v1108_v57  ;;  %v1115_v32 = vadd.f32 %v1112_v22, %v1097_v21 }
 0x22d   :  { %v1114_v15 = vadd.f32 %v1112_v22, %v1084_v8 }
 0x22e   :  { %v1116_v36 = vadd.f32 %v1112_v22, %v1110_v25 }
 0x22f   :  { %v1121_v34 = vcombine.low %v1113_v30, %v1114_v15 }
 0x230   :  { %v1122_v24 = vcombine.low %v1115_v32, %v1116_v36 }
 0x231   :  { %v1129_v35 = vrot.slane %v1121_v34, %v1128_v29 }
 0x232   :  { %v1136_v23 = vrot.slane %v1122_v24, %v1128_v29 }
 0x234   :  { %v1137_v10 = vcombine.low %v1129_v35, %v1136_v23 }
 0x236   :  { %v1144_v37 = vrot.slane %v1137_v10, %v1128_v29 }
 0x238   :  { %1150 = vst.msk [vmem:[#allocation3] sm:$0xf] %vm1148_vm2, %v1144_v37 }
 0x239   :  { %1551 = shalt.err (!%p1548_p4)
}
 0x23a   :  { %1160 = dma.vmem_to_hbm [thread:$0]  %s1158_s2, 64, %s2030_s7, [#allocation4]  }
 0x23b   :  { %1560 = dma.done.wait [#allocation4], 64  }
 0x23c   :  { %1561 = vsyncadd [#allocation4], 4294967232 }
 0x23d   :  { %1164 = vsyncpa [#allocation4], 1 }

</bundles_post_ra>
